<compile_context>
chip_gen: v6e
topology: v6e:2x2x1
jax: 0.10.0
libtpu: 0.0.40
codegen_flags: <defaults>
</compile_context>

<pallas_src>
import functools

import jax
import jax.numpy as jnp
from jax.experimental import pallas as pl
from jax.experimental.pallas import tpu as pltpu


def _round_up(n: int, m: int) -> int:
    return (n + m - 1) // m * m


def _cdiv(a: int, b: int) -> int:
    return (a + b - 1) // b


def _fused_mlp_kernel(*refs, n_layers: int):
    """refs = (x_ref, w0_ref, b0_ref, ..., w{L-1}_ref, b{L-1}_ref, o_ref).

    Hidden layers: Linear + ReLU (epilogue in the bias' dtype, i.e. the
    compute dtype).  Final layer: Linear + Identity with an f32 bias-add.
    Intermediates live only in vregs/VMEM.
    """
    x_ref = refs[0]
    o_ref = refs[-1]
    wb_refs = refs[1:-1]

    h = x_ref[...]
    for li in range(n_layers):
        w_ref = wb_refs[2 * li]
        b_ref = wb_refs[2 * li + 1]
        # Single cast of the activation to the MXU operand dtype (no-op after
        # the first layer since the hidden epilogue already emits that dtype).
        acc = jnp.dot(h.astype(w_ref.dtype), w_ref[...],
                      preferred_element_type=jnp.float32)
        if li < n_layers - 1:
            # Hidden: bias-add + ReLU in the compute dtype (bf16 on v6e/v7x).
            h = jnp.maximum(acc.astype(b_ref.dtype) + b_ref[...], 0)
        else:
            # Final: Identity activation, f32 bias-add for precision.
            h = acc + b_ref[...].astype(jnp.float32)
    o_ref[...] = h.astype(o_ref.dtype)


def naive_mlp_forward(xs, params, *, block_batch: int = 2048,
                      compute_dtype=jnp.bfloat16, out_dtype=None,
                      min_grid_steps: int = 1):
    """Runs the full MLP as one fused, batch-tiled Pallas kernel.

    xs: [B, Din].  params: list of (W [in,out], b [1,out]) per layer
    (W transposed vs. nn.Linear so the kernel computes y = x @ W + b).

    compute_dtype: MXU operand / hidden-epilogue dtype (bf16 default; pass
      jnp.float32 for exact parity with the f32 reference, ~3x slower MXU).
    out_dtype: output array dtype (defaults to xs.dtype; pass jnp.bfloat16 to
      halve output writeback when downstream tolerates it).
    min_grid_steps: set to 2 on v7x so both TensorCores get grid steps.
    """
    B, Din = xs.shape
    n_layers = len(params)
    Dout = params[-1][0].shape[1]
    out_dtype = xs.dtype if out_dtype is None else out_dtype

    # Balanced batch tiling: pick the number of grid steps first, then a tile
    # that is a multiple of 8 (sublane) and keeps B_pad - B small.
    n_steps = max(min_grid_steps, _cdiv(max(B, 1), block_batch))
    TB = max(8, _round_up(_cdiv(B, n_steps), 8))
    B_pad = TB * n_steps

    x = xs
    if B_pad != B:
        x = jnp.pad(x, ((0, B_pad - B), (0, 0)))

    flat_inputs = [x]
    in_specs = [pl.BlockSpec((TB, Din), lambda i: (i, 0))]
    for li, (w, b) in enumerate(params):
        is_last = li == n_layers - 1
        flat_inputs.append(w.astype(compute_dtype))   # MXU operands (bf16 def)
        # Hidden biases in the compute dtype (bf16 epilogue on v6e/v7x);
        # final bias stays f32 for the precise Identity-head bias-add.
        flat_inputs.append(b.astype(jnp.float32 if is_last else compute_dtype))
        # Constant block index -> weights/biases stay VMEM-resident.
        in_specs.append(pl.BlockSpec(tuple(w.shape), lambda i: (0, 0)))
        in_specs.append(pl.BlockSpec(tuple(b.shape), lambda i: (0, 0)))

    kernel = functools.partial(_fused_mlp_kernel, n_layers=n_layers)
    out = pl.pallas_call(
        kernel,
        # Unpadded output width: block last dim == full array dim (legal),
        # so writeback is only B_pad * Dout elements.
        out_shape=jax.ShapeDtypeStruct((B_pad, Dout), out_dtype),
        grid=(n_steps,),
        in_specs=in_specs,
        out_specs=pl.BlockSpec((TB, Dout), lambda i: (i, 0)),
        compiler_params=pltpu.CompilerParams(
            dimension_semantics=("parallel",),   # shard batch steps on v7x TCs
        ),
    )(*flat_inputs)
    return out[:B] if B_pad != B else out


def init_mlp_params(key, input_dim, output_dim, num_neurons=(64, 32),
                    dtype=jnp.float32):
    """Deterministic synthetic parameters matching nn.Linear shapes.

    Returns a list of (W [in,out], b [1,out]) per layer, with PyTorch-style
    Uniform(-1/sqrt(in), 1/sqrt(in)) init.
    """
    in_dims = [input_dim] + list(num_neurons)
    out_dims = list(num_neurons) + [output_dim]
    params = []
    for in_d, out_d in zip(in_dims, out_dims):
        key, kw, kb = jax.random.split(key, 3)
        bound = 1.0 / float(in_d) ** 0.5
        w = jax.random.uniform(kw, (in_d, out_d), dtype=dtype,
                               minval=-bound, maxval=bound)
        b = jax.random.uniform(kb, (1, out_d), dtype=dtype,
                               minval=-bound, maxval=bound)
        params.append((w, b))
    return params


def mlp_reference(xs, params):
    """Pure-JAX f32 reference (hidden ReLU, final Identity)."""
    h = xs
    for i, (w, b) in enumerate(params):
        h = h @ w + b
        if i < len(params) - 1:
            h = jnp.maximum(h, 0.0)
    return h


if __name__ == "__main__":
    key = jax.random.PRNGKey(0)
    k_x, k_x2, k_p = jax.random.split(key, 3)

    batch, input_dim, output_dim = 8, 16, 4
    x = jax.random.normal(k_x, (batch, input_dim), dtype=jnp.float32)
    params = init_mlp_params(k_p, input_dim, output_dim, num_neurons=(64, 32))
    ref = mlp_reference(x, params)

    # f32 matmul path: must match the reference tightly.
    y32 = naive_mlp_forward(x, params, compute_dtype=jnp.float32)
    y32 = jax.block_until_ready(y32)
    assert y32.shape == (batch, output_dim)
    assert jnp.allclose(y32, ref, atol=1e-5, rtol=1e-5)

    # Default bf16-operand / f32-accumulate path (bandwidth-optimized).
    y16 = naive_mlp_forward(x, params)
    y16 = jax.block_until_ready(y16)
    assert y16.shape == (batch, output_dim)
    assert jnp.allclose(y16, ref, atol=5e-2, rtol=5e-2)

    # Multi-step balanced batch tiling + padding (B not a tile multiple),
    # plus min_grid_steps=2 as would be used on v7x.
    batch2 = 200
    x2 = jax.random.normal(k_x2, (batch2, input_dim), dtype=jnp.float32)
    ref2 = mlp_reference(x2, params)
    y2 = naive_mlp_forward(x2, params, block_batch=64,
                           compute_dtype=jnp.float32, min_grid_steps=2)
    y2 = jax.block_until_ready(y2)
    assert y2.shape == (batch2, output_dim)
    assert jnp.allclose(y2, ref2, atol=1e-5, rtol=1e-5)

    # bf16 output writeback path (caller-side cast if f32 needed downstream).
    y16o = naive_mlp_forward(x2, params, out_dtype=jnp.bfloat16)
    y16o = jax.block_until_ready(y16o)
    assert y16o.shape == (batch2, output_dim)
    assert y16o.dtype == jnp.bfloat16
    assert jnp.allclose(y16o.astype(jnp.float32), ref2, atol=6e-2, rtol=6e-2)

    print("KERNEL_OK")
</pallas_src>

<mosaic_0001>
module attributes {stable_mosaic.version = 11 : i64} {
  func.func @_fused_mlp_kernel(%arg0: i32, %arg1: memref<8x16xf32, #tpu.memory_space<vmem>>, %arg2: memref<16x64xf32, #tpu.memory_space<vmem>>, %arg3: memref<1x64xf32, #tpu.memory_space<vmem>>, %arg4: memref<64x32xf32, #tpu.memory_space<vmem>>, %arg5: memref<1x32xf32, #tpu.memory_space<vmem>>, %arg6: memref<32x4xf32, #tpu.memory_space<vmem>>, %arg7: memref<1x4xf32, #tpu.memory_space<vmem>>, %arg8: memref<8x4xf32, #tpu.memory_space<vmem>>) attributes {dimension_semantics = [#tpu.dimension_semantics<parallel>], iteration_bounds = array<i64: 1>, scalar_prefetch = 0 : i64, scratch_operands = 0 : i64, tpu.core_type = #tpu.core_type<tc>, window_params = [{transform_indices = @transform_0, window_bounds = array<i64: 8, 16>}, {pipeline_mode = #tpu.pipeline_mode<synchronous>, transform_indices = @transform_1, window_bounds = array<i64: 16, 64>}, {pipeline_mode = #tpu.pipeline_mode<synchronous>, transform_indices = @transform_2, window_bounds = array<i64: 1, 64>}, {pipeline_mode = #tpu.pipeline_mode<synchronous>, transform_indices = @transform_3, window_bounds = array<i64: 64, 32>}, {pipeline_mode = #tpu.pipeline_mode<synchronous>, transform_indices = @transform_4, window_bounds = array<i64: 1, 32>}, {pipeline_mode = #tpu.pipeline_mode<synchronous>, transform_indices = @transform_5, window_bounds = array<i64: 32, 4>}, {pipeline_mode = #tpu.pipeline_mode<synchronous>, transform_indices = @transform_6, window_bounds = array<i64: 1, 4>}, {transform_indices = @transform_7, window_bounds = array<i64: 8, 4>}]} {
    %c0 = arith.constant 0 : index
    %c0_0 = arith.constant 0 : index
    %0 = vector.load %arg1[%c0, %c0_0] : memref<8x16xf32, #tpu.memory_space<vmem>>, vector<8x16xf32>
    %c0_1 = arith.constant 0 : index
    %c0_2 = arith.constant 0 : index
    %1 = vector.load %arg2[%c0_1, %c0_2] : memref<16x64xf32, #tpu.memory_space<vmem>>, vector<16x64xf32>
    %cst = arith.constant dense<0.000000e+00> : vector<8x64xf32>
    %2 = tpu.matmul %0, %1, %cst {dimension_numbers = #tpu.dot_dimension_numbers<[1], [0], [0], [1], [0, 0, 1, 1], [], []>} : vector<8x16xf32>, vector<16x64xf32>, vector<8x64xf32> -> vector<8x64xf32>
    %c0_3 = arith.constant 0 : index
    %c0_4 = arith.constant 0 : index
    %3 = vector.load %arg3[%c0_3, %c0_4] : memref<1x64xf32, #tpu.memory_space<vmem>>, vector<1x64xf32>
    %4 = vector.broadcast %3 : vector<1x64xf32> to vector<8x64xf32>
    %5 = arith.addf %2, %4 : vector<8x64xf32>
    %cst_5 = arith.constant 0.000000e+00 : f32
    %6 = vector.broadcast %cst_5 : f32 to vector<8x64xf32>
    %7 = arith.maximumf %5, %6 : vector<8x64xf32>
    %c0_6 = arith.constant 0 : index
    %c0_7 = arith.constant 0 : index
    %8 = vector.load %arg4[%c0_6, %c0_7] : memref<64x32xf32, #tpu.memory_space<vmem>>, vector<64x32xf32>
    %cst_8 = arith.constant dense<0.000000e+00> : vector<8x32xf32>
    %9 = tpu.matmul %7, %8, %cst_8 {dimension_numbers = #tpu.dot_dimension_numbers<[1], [0], [0], [1], [0, 0, 1, 1], [], []>} : vector<8x64xf32>, vector<64x32xf32>, vector<8x32xf32> -> vector<8x32xf32>
    %c0_9 = arith.constant 0 : index
    %c0_10 = arith.constant 0 : index
    %10 = vector.load %arg5[%c0_9, %c0_10] : memref<1x32xf32, #tpu.memory_space<vmem>>, vector<1x32xf32>
    %11 = vector.broadcast %10 : vector<1x32xf32> to vector<8x32xf32>
    %12 = arith.addf %9, %11 : vector<8x32xf32>
    %cst_11 = arith.constant 0.000000e+00 : f32
    %13 = vector.broadcast %cst_11 : f32 to vector<8x32xf32>
    %14 = arith.maximumf %12, %13 : vector<8x32xf32>
    %c0_12 = arith.constant 0 : index
    %c0_13 = arith.constant 0 : index
    %15 = vector.load %arg6[%c0_12, %c0_13] : memref<32x4xf32, #tpu.memory_space<vmem>>, vector<32x4xf32>
    %cst_14 = arith.constant dense<0.000000e+00> : vector<8x4xf32>
    %16 = tpu.matmul %14, %15, %cst_14 {dimension_numbers = #tpu.dot_dimension_numbers<[1], [0], [0], [1], [0, 0, 1, 1], [], []>} : vector<8x32xf32>, vector<32x4xf32>, vector<8x4xf32> -> vector<8x4xf32>
    %c0_15 = arith.constant 0 : index
    %c0_16 = arith.constant 0 : index
    %17 = vector.load %arg7[%c0_15, %c0_16] : memref<1x4xf32, #tpu.memory_space<vmem>>, vector<1x4xf32>
    %18 = vector.broadcast %17 : vector<1x4xf32> to vector<8x4xf32>
    %19 = arith.addf %16, %18 : vector<8x4xf32>
    %c0_17 = arith.constant 0 : index
    %c0_18 = arith.constant 0 : index
    %20 = vector.load %arg8[%c0_17, %c0_18] : memref<8x4xf32, #tpu.memory_space<vmem>>, vector<8x4xf32>
    tpu.vector_store %arg8[%c0_17, %c0_18], %19 {strides = array<i32>} : memref<8x4xf32, #tpu.memory_space<vmem>>, vector<8x4xf32>,
    return
  }
  func.func @transform_0(%arg0: i32) -> (i32, i32) {
    %c0_i32 = arith.constant 0 : i32
    %c0_i32_0 = arith.constant 0 : i32
    return %arg0, %c0_i32 : i32, i32
  }
  func.func @transform_1(%arg0: i32) -> (i32, i32) {
    %c0_i32 = arith.constant 0 : i32
    %c0_i32_0 = arith.constant 0 : i32
    %c0_i32_1 = arith.constant 0 : i32
    return %c0_i32, %c0_i32_0 : i32, i32
  }
  func.func @transform_2(%arg0: i32) -> (i32, i32) {
    %c0_i32 = arith.constant 0 : i32
    %c0_i32_0 = arith.constant 0 : i32
    %c0_i32_1 = arith.constant 0 : i32
    return %c0_i32, %c0_i32_0 : i32, i32
  }
  func.func @transform_3(%arg0: i32) -> (i32, i32) {
    %c0_i32 = arith.constant 0 : i32
    %c0_i32_0 = arith.constant 0 : i32
    %c0_i32_1 = arith.constant 0 : i32
    return %c0_i32, %c0_i32_0 : i32, i32
  }
  func.func @transform_4(%arg0: i32) -> (i32, i32) {
    %c0_i32 = arith.constant 0 : i32
    %c0_i32_0 = arith.constant 0 : i32
    %c0_i32_1 = arith.constant 0 : i32
    return %c0_i32, %c0_i32_0 : i32, i32
  }
  func.func @transform_5(%arg0: i32) -> (i32, i32) {
    %c0_i32 = arith.constant 0 : i32
    %c0_i32_0 = arith.constant 0 : i32
    %c0_i32_1 = arith.constant 0 : i32
    return %c0_i32, %c0_i32_0 : i32, i32
  }
  func.func @transform_6(%arg0: i32) -> (i32, i32) {
    %c0_i32 = arith.constant 0 : i32
    %c0_i32_0 = arith.constant 0 : i32
    %c0_i32_1 = arith.constant 0 : i32
    return %c0_i32, %c0_i32_0 : i32, i32
  }
  func.func @transform_7(%arg0: i32) -> (i32, i32) {
    %c0_i32 = arith.constant 0 : i32
    %c0_i32_0 = arith.constant 0 : i32
    return %arg0, %c0_i32 : i32, i32
  }
}

</mosaic_0001>

<bundles_post_ra>
// kernel: tpu_custom_call.1
= control target key start
LH: loop header
LB: loop body
LE: loop exit
PB: predicated region body
PF: predicated region fallthrough
CT: control target
= control target key end

     0   :  { %v354_v0 = vmov 0.0   ;;  %vm355_vm0 = vmmov 0   ;;  %vm36_vm1 = vcmask 130048   ;;  %vm126_vm2 = vcmask 523264   ;;  %s456_s1 = inlined_call_operand.vmem [shape: f32[16,64], index: 1, kind: input, shape index: {}]   ;;  %s457_s0 = inlined_call_operand.vmem [shape: f32[8,16], index: 0, kind: input, shape index: {}]   ;;  %s458_s3 = inlined_call_operand.vmem [shape: f32[64,32], index: 3, kind: input, shape index: {}]   ;;  %s459_s5 = inlined_call_operand.vmem [shape: f32[32,4], index: 5, kind: input, shape index: {}]   ;;  %s460_s2 = inlined_call_operand.vmem [shape: f32[1,64], index: 2, kind: input, shape index: {}]   ;;  %s461_s4 = inlined_call_operand.vmem [shape: f32[1,32], index: 4, kind: input, shape index: {}]   ;;  %s462_s6 = inlined_call_operand.vmem [shape: f32[1,4], index: 6, kind: input, shape index: {}]   ;;  %s463_s7 = inlined_call_operand.vmem [shape: f32[8,4], index: 7, kind: output, shape index: {}]  }
   0x1   :  { %315 = vmatprep.subr.mxu0 %v354_v0  ;;  %v28_v1 = vld [vmem:[%s456_s1 + $0x8] sm:$0xff]  ;;  %v27_v2 = vld [vmem:[%s456_s1] sm:$0xff]  ;;  %319 = vmatprep.mubr.msk.f32.mxu0 %vm355_vm0, %v354_v0  ;;  %v118_v4 = vld [vmem:[%s458_s3 + $0x38] sm:$0xff]  ;;  %vm212_vm3 = vcmask 261120   ;;  %vm286_vm4 = vcmask 31744  }
   0x2   :  { %316 = vmatpush3.msra.mxu0 %v28_v1  ;;  %v26_v3 = vld [vmem:[%s457_s0] sm:$0xff]  ;;  %322 = vmatprep.subr.mxu1 %v354_v0  ;;  %v117_v5 = vld [vmem:[%s458_s3 + $0x30] sm:$0xff]  ;;  %v116_v6 = vld [vmem:[%s458_s3 + $0x28] sm:$0xff] }
   0x3   :  { %317 = vmatprep.subr.mxu0 %v354_v0  ;;  %323 = vmatpush3.msra.mxu1 %v118_v4  ;;  %v115_v7 = vld [vmem:[%s458_s3 + $0x20] sm:$0xff]  ;;  %v114_v8 = vld [vmem:[%s458_s3 + $0x18] sm:$0xff]  ;;  %v113_v9 = vld [vmem:[%s458_s3 + $0x10] sm:$0xff] }
   0x4   :  { %318 = vmatpush3.msra.mxu0 %v27_v2  ;;  %324 = vmatprep.subr.mxu1 %v354_v0  ;;  %v112_v10 = vld [vmem:[%s458_s3 + $0x8] sm:$0xff]  ;;  %v111_v11 = vld [vmem:[%s458_s3] sm:$0xff]  ;;  %v204_v12 = vld [vmem:[%s459_s5 + $0x18] sm:$0xff] }
   0x5   :  { %320 = vmatmul.mubr.msk.f32.vlgmr.msra.gmra.mxu0 %vm36_vm1, %v26_v3  ;;  %325 = vmatpush3.msra.mxu1 %v117_v5  ;;  %v292_v13 = vld [vmem:[%s460_s2] ss:$0 sm:$0xff]  ;;  %v203_v18 = vld [vmem:[%s459_s5 + $0x10] sm:$0xff]  ;;  %v202_v19 = vld [vmem:[%s459_s5 + $0x8] sm:$0xff] }
   0x6   :  { %326 = vmatprep.subr.mxu1 %v354_v0  ;;  %338 = vmatprep.mubr.msk.f32.mxu1 %vm355_vm0, %v354_v0  ;;  %v201_v20 = vld [vmem:[%s459_s5] sm:$0xff] }
   0x7   :  { %327 = vmatpush3.msra.mxu1 %v116_v6  ;;  %341 = vmatprep.subr.mxu0 %v354_v0  ;;  %v294_v21 = vld [vmem:[%s461_s4] ss:$0 sm:$0xff] }
   0x8   :  { %328 = vmatprep.subr.mxu1 %v354_v0  ;;  %349 = vmatprep.mubr.msk.f32.mxu0 %vm355_vm0, %v354_v0  ;;  %v296_v26 = vld [vmem:[%s462_s6] ss:$0 sm:$0xff] }
   0x9   :  { %329 = vmatpush3.msra.mxu1 %v115_v7  ;;  %342 = vmatpush3.msra.mxu0 %v204_v12 }
   0xa   :  { %330 = vmatprep.subr.mxu1 %v354_v0  ;;  %343 = vmatprep.subr.mxu0 %v354_v0 }
   0xb   :  { %331 = vmatpush3.msra.mxu1 %v114_v8  ;;  %344 = vmatpush3.msra.mxu0 %v203_v18 }
   0xc   :  { %332 = vmatprep.subr.mxu1 %v354_v0  ;;  %345 = vmatprep.subr.mxu0 %v354_v0 }
   0xd   :  { %333 = vmatpush3.msra.mxu1 %v113_v9  ;;  %346 = vmatpush3.msra.mxu0 %v202_v19 }
   0xe   :  { %334 = vmatprep.subr.mxu1 %v354_v0  ;;  %347 = vmatprep.subr.mxu0 %v354_v0 }
   0xf   :  { %335 = vmatpush3.msra.mxu1 %v112_v10  ;;  %348 = vmatpush3.msra.mxu0 %v201_v20 }
  0x10   :  { %336 = vmatprep.subr.mxu1 %v354_v0 }
  0x11   :  { %337 = vmatpush3.msra.mxu1 %v111_v11 }
  0xc5   :  { %v106_v14 = vpop.f32.mrf.mxu0 }
  0xc6   :  { %v107_v15 = vadd.f32 %v292_v13, %v106_v14 }
  0xc7   :  { %v321_v16 = vpop.f32.mrf.mxu0 }
  0xc8   :  { %v110_v17 = vmax.f32 %v107_v15, 0.0 }
  0xca   :  { %339 = vmatmul.mubr.msk.f32.vlgmr.msra.gmra.mxu1 %vm126_vm2, %v110_v17 }
 0x18a   :  { %v196_v22 = vpop.f32.mrf.mxu1 }
 0x18b   :  { %v197_v23 = vadd.f32 %v294_v21, %v196_v22 }
 0x18c   :  { %v340_v24 = vpop.f32.mrf.mxu1 }
 0x18d   :  { %v200_v25 = vmax.f32 %v197_v23, 0.0 }
 0x18f   :  { %350 = vmatmul.mubr.msk.f32.vlgmr.msra.gmra.mxu0 %vm212_vm3, %v200_v25 }
 0x24f   :  { %v282_v27 = vpop.f32.mrf.mxu0 }
 0x250   :  { %v283_v28 = vadd.f32 %v296_v26, %v282_v27 }
 0x251   :  { %v351_v29 = vpop.f32.mrf.mxu0 }
 0x252   :  { %287 = vst.msk [vmem:[%s463_s7] sm:$0xff] %vm286_vm4, %v283_v28 }

</bundles_post_ra>
